<compile_context>
chip_gen: v6e
topology: v6e:2x2x1
jax: 0.10.0
libtpu: 0.0.40
codegen_flags: <defaults>
</compile_context>

<pallas_src>
import numpy as np

import jax
import jax.numpy as jnp
from jax.experimental import pallas as pl
from jax.experimental.pallas import tpu as pltpu


def _manager_kernel(x_ref, w1_ref, b1_ref, w2_ref, b2_ref, wh_ref, bh_ref,
                    scale_ref, offset_ref, stdmask_ref, out_ref):
    # --- MLP trunk: bf16 operands, f32 accumulation (native MXU path) -------
    x = x_ref[...].astype(jnp.bfloat16)

    h1 = jnp.dot(x, w1_ref[...], preferred_element_type=jnp.float32) + b1_ref[...]
    h1 = jnp.maximum(h1, 0.0).astype(jnp.bfloat16)

    h2 = jnp.dot(h1, w2_ref[...], preferred_element_type=jnp.float32) + b2_ref[...]
    h2 = jnp.maximum(h2, 0.0).astype(jnp.bfloat16)

    # --- fused mean|std head: one (tb, H) x (H, NPAD) matmul -----------------
    raw = jnp.dot(h2, wh_ref[...], preferred_element_type=jnp.float32) + bh_ref[...]

    # --- epilogue in f32 (v5e has no bf16 VPU/EUP path), cast on store -------
    #   mean/xy cols : tanh(raw) * xy_scale
    #   mean/z  cols : tanh(raw) * z_scale + z_scale
    #   std     cols : softplus(raw) + 1e-5   (1e-5 folded into offset vector)
    #   pad     cols : 0
    t = jnp.tanh(raw)
    sp = jnp.maximum(raw, 0.0) + jnp.log1p(jnp.exp(-jnp.abs(raw)))   # softplus
    out = t * scale_ref[...] + offset_ref[...] + stdmask_ref[...] * sp
    out_ref[...] = out.astype(out_ref.dtype)


def pack_params(w1, b1, w2, b2, wm, bm, ws, bs, *,
                num_agents, goal_size, xy_scale, z_scale):
    """Fuse + pad the head params and build the epilogue column vectors."""
    assert goal_size == 3, "epilogue mirrors the PyTorch [:, :, :2] / [:, :, 2] split"
    AG = num_agents * goal_size
    H = w1.shape[1]
    npad = ((2 * AG + 127) // 128) * 128          # lane-dense fused head width

    wh = jnp.zeros((H, npad), jnp.float32)
    wh = wh.at[:, :AG].set(wm).at[:, AG:2 * AG].set(ws)
    bh = jnp.zeros((1, npad), jnp.float32)
    bh = bh.at[:, :AG].set(jnp.reshape(bm, (1, AG)))
    bh = bh.at[:, AG:2 * AG].set(jnp.reshape(bs, (1, AG)))

    col = np.arange(npad)
    is_mean = col < AG
    is_std = (col >= AG) & (col < 2 * AG)
    comp = col % goal_size                         # component within a goal
    std_mask = is_std.astype(np.float64)
    col_scale = np.where(is_mean, np.where(comp < 2, xy_scale, z_scale), 0.0)
    # z-component offset, plus the 1e-5 std floor folded in (zero on pad cols).
    col_offset = np.where(is_mean & (comp == 2), z_scale, 0.0) + 1e-5 * std_mask

    return (w1.astype(jnp.bfloat16),
            jnp.reshape(b1, (1, H)).astype(jnp.float32),
            w2.astype(jnp.bfloat16),
            jnp.reshape(b2, (1, H)).astype(jnp.float32),
            wh.astype(jnp.bfloat16),
            bh,
            jnp.asarray(col_scale, jnp.float32).reshape(1, npad),
            jnp.asarray(col_offset, jnp.float32).reshape(1, npad),
            jnp.asarray(std_mask, jnp.float32).reshape(1, npad))


def _round_up(a, b):
    return -(-a // b) * b


def _plan_batch_tiling(B, batch_tile, *, row_quantum=16, min_steps=2):
    """Pick (tb, B_pad, n_steps): tb a multiple of `row_quantum` (bf16 output
    sublane packing), >=2 grid steps when B allows (v7x dual-TC split), and the
    tile derived from the step count so padded-row waste is minimised."""
    Bq = _round_up(B, row_quantum)
    tb_cap = max(row_quantum, _round_up(min(batch_tile, Bq), row_quantum))
    n_steps = -(-Bq // tb_cap)
    if Bq // row_quantum >= min_steps:             # enough rows to split
        n_steps = max(n_steps, min_steps)
    tb = _round_up(-(-Bq // n_steps), row_quantum)
    return tb, n_steps * tb, n_steps


def manager_forward(x, packed, *, num_agents, goal_size, batch_tile=512,
                    return_packed=False):
    """x: (B, state_size) f32. Returns (mean, std), each (B, num_agents, goal_size) f32.

    batch_tile: sweep 512-1024 for large B (kernel is HBM/overhead-bound).
    return_packed: return the lane-dense (B, 2*AG) bf16 slab instead of the two
    sliced/reshaped f32 arrays (saves two extra HBM passes downstream).
    """
    w1, b1, w2, b2, wh, bh, col_scale, col_offset, std_mask = packed
    B, S = x.shape
    H = w1.shape[1]
    AG = num_agents * goal_size
    npad = wh.shape[1]

    tb, B_pad, n_steps = _plan_batch_tiling(B, batch_tile)
    if B_pad != B:
        x = jnp.pad(x, ((0, B_pad - B), (0, 0)))
    grid = (n_steps,)

    # Weights / bias / epilogue vectors stay resident across all batch tiles.
    resident = lambda a: pl.BlockSpec(a.shape, lambda i: (0,) * a.ndim)

    flops = 2 * B_pad * (S * H + H * H + H * npad)
    resident_bytes = sum(int(a.size) * a.dtype.itemsize
                         for a in (w1, b1, w2, b2, wh, bh,
                                   col_scale, col_offset, std_mask))
    bytes_accessed = int(x.size * x.dtype.itemsize + resident_bytes
                         + B_pad * npad * 2)       # bf16 writeback
    cost = pl.CostEstimate(flops=flops,
                           transcendentals=3 * B_pad * npad,
                           bytes_accessed=bytes_accessed)

    # Explicit scoped-VMEM budget (v5e default is only 16 MiB): double-buffered
    # x/out tiles + resident weights + headroom for (tb, H) f32 intermediates.
    vmem_need = (2 * (tb * S * 4 + tb * npad * 2)
                 + 2 * resident_bytes
                 + 8 * tb * H * 4)
    vmem_limit = int(min(max(vmem_need, 16 << 20), 32 << 20))

    out = pl.pallas_call(
        _manager_kernel,
        out_shape=jax.ShapeDtypeStruct((B_pad, npad), jnp.bfloat16),
        grid=grid,
        in_specs=[
            pl.BlockSpec((tb, S), lambda i: (i, 0)),          # x: tiled over batch
            resident(w1), resident(b1), resident(w2), resident(b2),
            resident(wh), resident(bh),
            resident(col_scale), resident(col_offset), resident(std_mask),
        ],
        out_specs=pl.BlockSpec((tb, npad), lambda i: (i, 0)),  # lane-dense slab
        compiler_params=pltpu.CompilerParams(
            dimension_semantics=("parallel",),                 # v7x: 2 TCs
            vmem_limit_bytes=vmem_limit),
        cost_estimate=cost,
    )(x, w1, b1, w2, b2, wh, bh, col_scale, col_offset, std_mask)

    if return_packed:
        return out[:B, :2 * AG]

    mean = out[:B, :AG].astype(jnp.float32).reshape(B, num_agents, goal_size)
    std = out[:B, AG:2 * AG].astype(jnp.float32).reshape(B, num_agents, goal_size)
    return mean, std


def init_params(key, state_size, hidden_size, num_agents, goal_size):
    AG = num_agents * goal_size
    ks = jax.random.split(key, 8)
    scale = 0.1
    w1 = jax.random.normal(ks[0], (state_size, hidden_size), jnp.float32) * scale
    b1 = jax.random.normal(ks[1], (1, hidden_size), jnp.float32) * scale
    w2 = jax.random.normal(ks[2], (hidden_size, hidden_size), jnp.float32) * scale
    b2 = jax.random.normal(ks[3], (1, hidden_size), jnp.float32) * scale
    wm = jax.random.normal(ks[4], (hidden_size, AG), jnp.float32) * scale
    bm = jax.random.normal(ks[5], (1, AG), jnp.float32) * scale
    ws = jax.random.normal(ks[6], (hidden_size, AG), jnp.float32) * scale
    bs = jax.random.normal(ks[7], (1, AG), jnp.float32) * scale
    # NOTE: fc_value exists in the PyTorch module but is unused in forward().
    return (w1, b1, w2, b2, wm, bm, ws, bs)


def _reference_f32(x, params, num_agents, goal_size, xy_scale, z_scale):
    """Pure-f32 PyTorch-semantics reference."""
    w1, b1, w2, b2, wm, bm, ws, bs = params
    h1 = jnp.maximum(x @ w1 + b1, 0.0)
    h2 = jnp.maximum(h1 @ w2 + b2, 0.0)
    raw_mean = (h2 @ wm + bm).reshape(-1, num_agents, goal_size)
    raw_std = (h2 @ ws + bs).reshape(-1, num_agents, goal_size)
    std = jax.nn.softplus(raw_std) + 1e-5
    xy_mean = jnp.tanh(raw_mean[:, :, :2]) * xy_scale
    z_mean = (jnp.tanh(raw_mean[:, :, 2]) + 1.0) * z_scale
    mean = jnp.concatenate([xy_mean, z_mean[..., None]], axis=-1)
    return mean, std


def _reference_bf16(x, packed, num_agents, goal_size):
    """Reference with the same bf16-operand / f32-accumulation quantization."""
    w1, b1, w2, b2, wh, bh, col_scale, col_offset, std_mask = packed
    AG = num_agents * goal_size
    xb = x.astype(jnp.bfloat16)
    h1 = jnp.maximum(jnp.dot(xb, w1, preferred_element_type=jnp.float32) + b1, 0.0)
    h2 = jnp.maximum(jnp.dot(h1.astype(jnp.bfloat16), w2,
                             preferred_element_type=jnp.float32) + b2, 0.0)
    raw = jnp.dot(h2.astype(jnp.bfloat16), wh,
                  preferred_element_type=jnp.float32) + bh
    out = jnp.tanh(raw) * col_scale + col_offset + std_mask * jax.nn.softplus(raw)
    mean = out[:, :AG].reshape(-1, num_agents, goal_size)
    std = out[:, AG:2 * AG].reshape(-1, num_agents, goal_size)
    return mean, std


def _check(x, raw_params, packed, num_agents, goal_size, xy_scale, z_scale):
    B = x.shape[0]
    mean, std = manager_forward(x, packed,
                                num_agents=num_agents, goal_size=goal_size)
    jax.block_until_ready((mean, std))
    assert mean.shape == (B, num_agents, goal_size)
    assert std.shape == (B, num_agents, goal_size)

    # Moderately tight vs. same-quantization reference (kernel logic + bf16 out),
    # loose vs. the pure-f32 PyTorch-semantics reference (bf16 accuracy).
    ref_m_bf, ref_s_bf = _reference_bf16(x, packed, num_agents, goal_size)
    ref_m_32, ref_s_32 = _reference_f32(x, raw_params, num_agents, goal_size,
                                        xy_scale, z_scale)
    assert jnp.allclose(mean, ref_m_bf, atol=1e-2, rtol=1e-2)
    assert jnp.allclose(std, ref_s_bf, atol=1e-2, rtol=1e-2)
    assert jnp.allclose(mean, ref_m_32, atol=5e-2, rtol=5e-2)
    assert jnp.allclose(std, ref_s_32, atol=5e-2, rtol=5e-2)


if __name__ == "__main__":
    # Small, module-consistent shapes.
    state_size = 32
    hidden_size = 128
    num_agents = 4
    goal_size = 3
    xy_scale = 1.5
    z_scale = 0.5

    key = jax.random.PRNGKey(0)
    kx1, kx2, kp = jax.random.split(key, 3)
    raw_params = init_params(kp, state_size, hidden_size, num_agents, goal_size)
    packed = pack_params(*raw_params, num_agents=num_agents, goal_size=goal_size,
                         xy_scale=xy_scale, z_scale=z_scale)

    # 1) tiny batch (single grid step), 2) awkward batch (2-step parallel grid).
    x_small = jax.random.normal(kx1, (2, state_size), jnp.float32)
    x_multi = jax.random.normal(kx2, (40, state_size), jnp.float32)
    _check(x_small, raw_params, packed, num_agents, goal_size, xy_scale, z_scale)
    _check(x_multi, raw_params, packed, num_agents, goal_size, xy_scale, z_scale)

    print("KERNEL_OK")
</pallas_src>

<mosaic_0001>
module attributes {stable_mosaic.version = 11 : i64} {
  func.func @_manager_kernel(%arg0: i32, %arg1: memref<16x32xf32, #tpu.memory_space<vmem>>, %arg2: memref<32x128xbf16, #tpu.memory_space<vmem>>, %arg3: memref<1x128xf32, #tpu.memory_space<vmem>>, %arg4: memref<128x128xbf16, #tpu.memory_space<vmem>>, %arg5: memref<1x128xf32, #tpu.memory_space<vmem>>, %arg6: memref<128x128xbf16, #tpu.memory_space<vmem>>, %arg7: memref<1x128xf32, #tpu.memory_space<vmem>>, %arg8: memref<1x128xf32, #tpu.memory_space<vmem>>, %arg9: memref<1x128xf32, #tpu.memory_space<vmem>>, %arg10: memref<1x128xf32, #tpu.memory_space<vmem>>, %arg11: memref<16x128xbf16, #tpu.memory_space<vmem>>) attributes {dimension_semantics = [#tpu.dimension_semantics<parallel>], iteration_bounds = array<i64: 1>, scalar_prefetch = 0 : i64, scratch_operands = 0 : i64, tpu.core_type = #tpu.core_type<tc>, window_params = [{transform_indices = @transform_0, window_bounds = array<i64: 16, 32>}, {pipeline_mode = #tpu.pipeline_mode<synchronous>, transform_indices = @transform_1, window_bounds = array<i64: 32, 128>}, {pipeline_mode = #tpu.pipeline_mode<synchronous>, transform_indices = @transform_2, window_bounds = array<i64: 1, 128>}, {pipeline_mode = #tpu.pipeline_mode<synchronous>, transform_indices = @transform_3, window_bounds = array<i64: 128, 128>}, {pipeline_mode = #tpu.pipeline_mode<synchronous>, transform_indices = @transform_4, window_bounds = array<i64: 1, 128>}, {pipeline_mode = #tpu.pipeline_mode<synchronous>, transform_indices = @transform_5, window_bounds = array<i64: 128, 128>}, {pipeline_mode = #tpu.pipeline_mode<synchronous>, transform_indices = @transform_6, window_bounds = array<i64: 1, 128>}, {pipeline_mode = #tpu.pipeline_mode<synchronous>, transform_indices = @transform_7, window_bounds = array<i64: 1, 128>}, {pipeline_mode = #tpu.pipeline_mode<synchronous>, transform_indices = @transform_8, window_bounds = array<i64: 1, 128>}, {pipeline_mode = #tpu.pipeline_mode<synchronous>, transform_indices = @transform_9, window_bounds = array<i64: 1, 128>}, {transform_indices = @transform_10, window_bounds = array<i64: 16, 128>}]} {
    %c0 = arith.constant 0 : index
    %c0_0 = arith.constant 0 : index
    %0 = vector.load %arg1[%c0, %c0_0] : memref<16x32xf32, #tpu.memory_space<vmem>>, vector<16x32xf32>
    %1 = arith.truncf %0 : vector<16x32xf32> to vector<16x32xbf16>
    %c0_1 = arith.constant 0 : index
    %c0_2 = arith.constant 0 : index
    %2 = vector.load %arg2[%c0_1, %c0_2] : memref<32x128xbf16, #tpu.memory_space<vmem>>, vector<32x128xbf16>
    %cst = arith.constant dense<0.000000e+00> : vector<16x128xf32>
    %3 = tpu.matmul %1, %2, %cst {dimension_numbers = #tpu.dot_dimension_numbers<[1], [0], [0], [1], [0, 0, 1, 1], [], []>} : vector<16x32xbf16>, vector<32x128xbf16>, vector<16x128xf32> -> vector<16x128xf32>
    %c0_3 = arith.constant 0 : index
    %c0_4 = arith.constant 0 : index
    %4 = vector.load %arg3[%c0_3, %c0_4] : memref<1x128xf32, #tpu.memory_space<vmem>>, vector<1x128xf32>
    %5 = vector.broadcast %4 : vector<1x128xf32> to vector<16x128xf32>
    %6 = arith.addf %3, %5 : vector<16x128xf32>
    %cst_5 = arith.constant 0.000000e+00 : f32
    %7 = vector.broadcast %cst_5 : f32 to vector<16x128xf32>
    %8 = arith.maximumf %6, %7 : vector<16x128xf32>
    %9 = arith.truncf %8 : vector<16x128xf32> to vector<16x128xbf16>
    %c0_6 = arith.constant 0 : index
    %c0_7 = arith.constant 0 : index
    %10 = vector.load %arg4[%c0_6, %c0_7] : memref<128x128xbf16, #tpu.memory_space<vmem>>, vector<128x128xbf16>
    %cst_8 = arith.constant dense<0.000000e+00> : vector<16x128xf32>
    %11 = tpu.matmul %9, %10, %cst_8 {dimension_numbers = #tpu.dot_dimension_numbers<[1], [0], [0], [1], [0, 0, 1, 1], [], []>} : vector<16x128xbf16>, vector<128x128xbf16>, vector<16x128xf32> -> vector<16x128xf32>
    %c0_9 = arith.constant 0 : index
    %c0_10 = arith.constant 0 : index
    %12 = vector.load %arg5[%c0_9, %c0_10] : memref<1x128xf32, #tpu.memory_space<vmem>>, vector<1x128xf32>
    %13 = vector.broadcast %12 : vector<1x128xf32> to vector<16x128xf32>
    %14 = arith.addf %11, %13 : vector<16x128xf32>
    %cst_11 = arith.constant 0.000000e+00 : f32
    %15 = vector.broadcast %cst_11 : f32 to vector<16x128xf32>
    %16 = arith.maximumf %14, %15 : vector<16x128xf32>
    %17 = arith.truncf %16 : vector<16x128xf32> to vector<16x128xbf16>
    %c0_12 = arith.constant 0 : index
    %c0_13 = arith.constant 0 : index
    %18 = vector.load %arg6[%c0_12, %c0_13] : memref<128x128xbf16, #tpu.memory_space<vmem>>, vector<128x128xbf16>
    %cst_14 = arith.constant dense<0.000000e+00> : vector<16x128xf32>
    %19 = tpu.matmul %17, %18, %cst_14 {dimension_numbers = #tpu.dot_dimension_numbers<[1], [0], [0], [1], [0, 0, 1, 1], [], []>} : vector<16x128xbf16>, vector<128x128xbf16>, vector<16x128xf32> -> vector<16x128xf32>
    %c0_15 = arith.constant 0 : index
    %c0_16 = arith.constant 0 : index
    %20 = vector.load %arg7[%c0_15, %c0_16] : memref<1x128xf32, #tpu.memory_space<vmem>>, vector<1x128xf32>
    %21 = vector.broadcast %20 : vector<1x128xf32> to vector<16x128xf32>
    %22 = arith.addf %19, %21 : vector<16x128xf32>
    %23 = math.tanh %22 : vector<16x128xf32>
    %cst_17 = arith.constant 0.000000e+00 : f32
    %24 = vector.broadcast %cst_17 : f32 to vector<16x128xf32>
    %25 = arith.maximumf %22, %24 : vector<16x128xf32>
    %26 = math.absf %22 : vector<16x128xf32>
    %cst_18 = arith.constant 0.000000e+00 : f32
    %27 = vector.broadcast %cst_18 : f32 to vector<16x128xf32>
    %28 = arith.subf %27, %26 : vector<16x128xf32>
    %29 = math.exp %28 : vector<16x128xf32>
    %30 = math.log1p %29 : vector<16x128xf32>
    %31 = arith.addf %25, %30 : vector<16x128xf32>
    %c0_19 = arith.constant 0 : index
    %c0_20 = arith.constant 0 : index
    %32 = vector.load %arg8[%c0_19, %c0_20] : memref<1x128xf32, #tpu.memory_space<vmem>>, vector<1x128xf32>
    %33 = vector.broadcast %32 : vector<1x128xf32> to vector<16x128xf32>
    %34 = arith.mulf %23, %33 : vector<16x128xf32>
    %c0_21 = arith.constant 0 : index
    %c0_22 = arith.constant 0 : index
    %35 = vector.load %arg9[%c0_21, %c0_22] : memref<1x128xf32, #tpu.memory_space<vmem>>, vector<1x128xf32>
    %36 = vector.broadcast %35 : vector<1x128xf32> to vector<16x128xf32>
    %37 = arith.addf %34, %36 : vector<16x128xf32>
    %c0_23 = arith.constant 0 : index
    %c0_24 = arith.constant 0 : index
    %38 = vector.load %arg10[%c0_23, %c0_24] : memref<1x128xf32, #tpu.memory_space<vmem>>, vector<1x128xf32>
    %39 = vector.broadcast %38 : vector<1x128xf32> to vector<16x128xf32>
    %40 = arith.mulf %39, %31 : vector<16x128xf32>
    %41 = arith.addf %37, %40 : vector<16x128xf32>
    %42 = arith.truncf %41 : vector<16x128xf32> to vector<16x128xbf16>
    %c0_25 = arith.constant 0 : index
    %c0_26 = arith.constant 0 : index
    %43 = vector.load %arg11[%c0_25, %c0_26] : memref<16x128xbf16, #tpu.memory_space<vmem>>, vector<16x128xbf16>
    tpu.vector_store %arg11[%c0_25, %c0_26], %42 {strides = array<i32>} : memref<16x128xbf16, #tpu.memory_space<vmem>>, vector<16x128xbf16>,
    return
  }
  func.func @transform_0(%arg0: i32) -> (i32, i32) {
    %c0_i32 = arith.constant 0 : i32
    %c0_i32_0 = arith.constant 0 : i32
    return %arg0, %c0_i32 : i32, i32
  }
  func.func @transform_1(%arg0: i32) -> (i32, i32) {
    %c0_i32 = arith.constant 0 : i32
    %c0_i32_0 = arith.constant 0 : i32
    %c0_i32_1 = arith.constant 0 : i32
    return %c0_i32, %c0_i32_0 : i32, i32
  }
  func.func @transform_2(%arg0: i32) -> (i32, i32) {
    %c0_i32 = arith.constant 0 : i32
    %c0_i32_0 = arith.constant 0 : i32
    %c0_i32_1 = arith.constant 0 : i32
    return %c0_i32, %c0_i32_0 : i32, i32
  }
  func.func @transform_3(%arg0: i32) -> (i32, i32) {
    %c0_i32 = arith.constant 0 : i32
    %c0_i32_0 = arith.constant 0 : i32
    %c0_i32_1 = arith.constant 0 : i32
    return %c0_i32, %c0_i32_0 : i32, i32
  }
  func.func @transform_4(%arg0: i32) -> (i32, i32) {
    %c0_i32 = arith.constant 0 : i32
    %c0_i32_0 = arith.constant 0 : i32
    %c0_i32_1 = arith.constant 0 : i32
    return %c0_i32, %c0_i32_0 : i32, i32
  }
  func.func @transform_5(%arg0: i32) -> (i32, i32) {
    %c0_i32 = arith.constant 0 : i32
    %c0_i32_0 = arith.constant 0 : i32
    %c0_i32_1 = arith.constant 0 : i32
    return %c0_i32, %c0_i32_0 : i32, i32
  }
  func.func @transform_6(%arg0: i32) -> (i32, i32) {
    %c0_i32 = arith.constant 0 : i32
    %c0_i32_0 = arith.constant 0 : i32
    %c0_i32_1 = arith.constant 0 : i32
    return %c0_i32, %c0_i32_0 : i32, i32
  }
  func.func @transform_7(%arg0: i32) -> (i32, i32) {
    %c0_i32 = arith.constant 0 : i32
    %c0_i32_0 = arith.constant 0 : i32
    %c0_i32_1 = arith.constant 0 : i32
    return %c0_i32, %c0_i32_0 : i32, i32
  }
  func.func @transform_8(%arg0: i32) -> (i32, i32) {
    %c0_i32 = arith.constant 0 : i32
    %c0_i32_0 = arith.constant 0 : i32
    %c0_i32_1 = arith.constant 0 : i32
    return %c0_i32, %c0_i32_0 : i32, i32
  }
  func.func @transform_9(%arg0: i32) -> (i32, i32) {
    %c0_i32 = arith.constant 0 : i32
    %c0_i32_0 = arith.constant 0 : i32
    %c0_i32_1 = arith.constant 0 : i32
    return %c0_i32, %c0_i32_0 : i32, i32
  }
  func.func @transform_10(%arg0: i32) -> (i32, i32) {
    %c0_i32 = arith.constant 0 : i32
    %c0_i32_0 = arith.constant 0 : i32
    return %arg0, %c0_i32 : i32, i32
  }
}

</mosaic_0001>

<bundles_post_ra>
// kernel: tpu_custom_call.1
= control target key start
LH: loop header
LB: loop body
LE: loop exit
PB: predicated region body
PF: predicated region fallthrough
CT: control target
= control target key end

     0   :  { %15 = vsyncpa [#allocation3], 0  ;;  %s870_s0 = inlined_call_operand.hbm [shape: f32[16,32], index: 0, kind: input, shape index: {}]   ;;  %s871_s1 = inlined_call_operand.hbm [shape: bf16[32,128], index: 1, kind: input, shape index: {}]   ;;  %s872_s2 = inlined_call_operand.vmem [shape: f32[1,128], index: 2, kind: input, shape index: {}]   ;;  %s873_s3 = inlined_call_operand.hbm [shape: bf16[128,128], index: 3, kind: input, shape index: {}]   ;;  %s874_s4 = inlined_call_operand.vmem [shape: f32[1,128], index: 4, kind: input, shape index: {}]   ;;  %s875_s5 = inlined_call_operand.hbm [shape: bf16[128,128], index: 5, kind: input, shape index: {}]   ;;  %s876_s6 = inlined_call_operand.vmem [shape: f32[1,128], index: 6, kind: input, shape index: {}]   ;;  %s877_s7 = inlined_call_operand.vmem [shape: f32[1,128], index: 7, kind: input, shape index: {}]   ;;  %s878_s8 = inlined_call_operand.vmem [shape: f32[1,128], index: 8, kind: input, shape index: {}]   ;;  %s879_s9 = inlined_call_operand.vmem [shape: f32[1,128], index: 9, kind: input, shape index: {}]   ;;  %s880_s10 = inlined_call_operand.hbm [shape: bf16[16,128], index: 10, kind: output, shape index: {}]  }
   0x1   :  { %16 = vsyncpa [#allocation6], 0 }
   0x2   :  { %17 = vsyncpa [#allocation9], 0 }
   0x3   :  { %18 = vsyncpa [#allocation4], 0  ;;  %s735_s13 = smov [#allocation5]  }
   0x4   :  { %s36_s14 = sshll.u32 %s735_s13, 4  ;;  %s37_s14 = int_to_ptr.vmem [resolvable:$true] %s36_s14 }
   0x5   :  { %s635_s15 = scalar_lea.vmem %s37_s14, 256  ;;  %p640_p1 = scmp.lt.s32.totalorder %s37_s14, %s37_s14 }
   0x6   :  { %p636_p0 = scmp.ne.s32.totalorder %s37_s14, %s635_s15  ;;  %p641_p2 = scmp.lt.s32.totalorder %s635_s15, %s635_s15 }
   0x8   :  { %p642_p3 = por %p641_p2, %p640_p1 }
   0xa   :  { %p643_p4 = pnand %p642_p3, %p636_p0 }
   0xc   :  { %646 = shalt.err (!%p643_p4)
}
   0xd   :  { %s736_s16 = smov 64   ;;  %s737_s17 = smov 4  }
   0xe   :  { %42 = dma.hbm_to_vmem [thread:$0]  %s871_s1, 256, %s37_s14, [#allocation6], %s736_s16, %s736_s16, %s737_s17  }
   0xf   :  { %s738_s20 = smov [#allocation2]  }
  0x10   :  { %s24_s21 = sshll.u32 %s738_s20, 4  ;;  %s25_s21 = int_to_ptr.vmem [resolvable:$true] %s24_s21 }
  0x11   :  { %s655_s22 = scalar_lea.vmem %s25_s21, 256  ;;  %p660_p6 = scmp.lt.s32.totalorder %s25_s21, %s25_s21 }
  0x12   :  { %p656_p5 = scmp.ne.s32.totalorder %s25_s21, %s655_s22  ;;  %p661_p7 = scmp.lt.s32.totalorder %s655_s22, %s655_s22 }
  0x14   :  { %p662_p8 = por %p661_p7, %p660_p6 }
  0x16   :  { %p663_p9 = pnand %p662_p8, %p656_p5 }
  0x18   :  { %666 = shalt.err (!%p663_p9)
}
  0x19   :  { %s739_s23 = smov 128   ;;  %s740_s24 = smov 8  }
  0x1a   :  { %30 = dma.hbm_to_vmem [thread:$0]  %s870_s0, 256, %s25_s21, [#allocation3], %s739_s23, %s739_s23, %s740_s24  }
  0x1b   :  { %s741_s27 = smov [#allocation7]   ;;  %s742_s29 = smov [#allocation8]  }
  0x1c   :  { %s50_s28 = sshll.u32 %s741_s27, 4  ;;  %s64_s1 = sshll.u32 %s742_s29, 4  ;;  %s51_s28 = int_to_ptr.vmem [resolvable:$true] %s50_s28  ;;  %s65_s1 = int_to_ptr.vmem [resolvable:$true] %s64_s1 }
  0x1d   :  { %s675_s30 = scalar_lea.vmem %s51_s28, 1024  ;;  %p680_p11 = scmp.lt.s32.totalorder %s51_s28, %s51_s28 }
  0x1e   :  { %p676_p10 = scmp.ne.s32.totalorder %s51_s28, %s675_s30  ;;  %p681_p12 = scmp.lt.s32.totalorder %s675_s30, %s675_s30 }
  0x20   :  { %p682_p13 = por %p681_p12, %p680_p11 }
  0x22   :  { %p683_p0 = pnand %p682_p13, %p676_p10 }
  0x24   :  { %686 = shalt.err (!%p683_p0)
}
  0x25   :  { %56 = dma.hbm_to_vmem [thread:$0]  %s873_s3, 1024, %s51_s28, [#allocation6], %s736_s16, %s736_s16, %s737_s17  }
  0x26   :  { %s695_s0 = scalar_lea.vmem %s65_s1, 1024  ;;  %p700_p2 = scmp.lt.s32.totalorder %s65_s1, %s65_s1 }
  0x27   :  { %p696_p1 = scmp.ne.s32.totalorder %s65_s1, %s695_s0  ;;  %p701_p3 = scmp.lt.s32.totalorder %s695_s0, %s695_s0 }
  0x29   :  { %p702_p4 = por %p701_p3, %p700_p2 }
  0x2b   :  { %p703_p5 = pnand %p702_p4, %p696_p1 }
  0x2d   :  { %706 = shalt.err (!%p703_p5)
}
  0x2e   :  { %70 = dma.hbm_to_vmem [thread:$0]  %s875_s5, 1024, %s65_s1, [#allocation9], %s736_s16, %s736_s16, %s737_s17  }
  0x2f   :  { %727 = dma.done.wait [#allocation3], 256  }
  0x30   :  { %728 = vsyncadd [#allocation3], 4294967040 }
  0x31   :  { %729 = dma.done.wait [#allocation6], 1280  }
  0x32   :  { %730 = vsyncadd [#allocation6], 4294966016 }
  0x33   :  { %731 = dma.done.wait [#allocation9], 1024  }
  0x34   :  { %732 = vsyncadd [#allocation9], 4294966272  ;;  %v743_v0 = vmov 0.0   ;;  %vm744_vm0 = vmmov 0   ;;  %v597_v1 = vld [vmem:[#allocation5 + $0x8] sm:$0xff]   ;;  %v598_v2 = vld [vmem:[#allocation5] sm:$0xff]  }
  0x35   :  { %538 = vmatprep.subr.bf16.mxu0 %v743_v0  ;;  %542 = vmatprep.mubr.msk.bf16.mxu0 %vm744_vm0, %v743_v0  ;;  %v92_v3 = vld [vmem:[#allocation2] sm:$0xff]  ;;  %v93_v4 = vld [vmem:[#allocation2 + $0x8] sm:$0xff]  ;;  %v599_v5 = vld [vmem:[#allocation7 + $0x38] sm:$0xff]   ;;  %vm118_vm1 = vcmask 261120  }
  0x36   :  { %546 = vmatprep.subr.bf16.mxu1 %v743_v0  ;;  %562 = vmatprep.mubr.msk.bf16.mxu1 %vm744_vm0, %v743_v0  ;;  %v94_v6 = vpack.c.bf16 %v93_v4, %v92_v3  ;;  %v600_v7 = vld [vmem:[#allocation7 + $0x30] sm:$0xff]   ;;  %v601_v8 = vld [vmem:[#allocation7 + $0x28] sm:$0xff]   ;;  %v602_v9 = vld [vmem:[#allocation7 + $0x20] sm:$0xff]  }
  0x37   :  { %539 = vmatpush3.bf16.msra.mxu0 %v597_v1  ;;  %547 = vmatpush3.bf16.msra.mxu1 %v599_v5  ;;  %v603_v10 = vld [vmem:[#allocation7 + $0x18] sm:$0xff]   ;;  %v604_v11 = vld [vmem:[#allocation7 + $0x10] sm:$0xff]   ;;  %v605_v12 = vld [vmem:[#allocation7 + $0x8] sm:$0xff]  }
  0x38   :  { %540 = vmatprep.subr.bf16.mxu0 %v743_v0  ;;  %548 = vmatprep.subr.bf16.mxu1 %v743_v0  ;;  %v606_v13 = vld [vmem:[#allocation7] sm:$0xff]   ;;  %v607_v14 = vld [vmem:[#allocation8 + $0x38] sm:$0xff]   ;;  %v608_v15 = vld [vmem:[#allocation8 + $0x30] sm:$0xff]  }
  0x39   :  { %v609_v16 = vld [vmem:[#allocation8 + $0x28] sm:$0xff]   ;;  %v610_v17 = vld [vmem:[#allocation8 + $0x20] sm:$0xff]   ;;  %v611_v18 = vld [vmem:[#allocation8 + $0x18] sm:$0xff]  }
  0x3a   :  { %v483_v19 = vld [vmem:[%s872_s2] ss:$0 sm:$0xff]  ;;  %v612_v29 = vld [vmem:[#allocation8 + $0x10] sm:$0xff]   ;;  %v613_v30 = vld [vmem:[#allocation8 + $0x8] sm:$0xff]  }
  0x3b   :  { %541 = vmatpush3.bf16.msra.mxu0 %v598_v2  ;;  %549 = vmatpush3.bf16.msra.mxu1 %v600_v7  ;;  %v614_v31 = vld [vmem:[#allocation8] sm:$0xff]  }
  0x3c   :  { %566 = vmatprep.subr.bf16.mxu0 %v743_v0  ;;  %550 = vmatprep.subr.bf16.mxu1 %v743_v0  ;;  %v487_v32 = vld [vmem:[%s874_s4] ss:$0 sm:$0xff] }
  0x3d   :  { %v496_v42 = vld [vmem:[%s876_s6] ss:$0 sm:$0xff] }
  0x3e   :  { %543 = vmatmul.mubr.msk.bf16.vlgmr.msra.gmra.mxu0 %vm118_vm1, %v94_v6 }
  0x3f   :  { %582 = vmatprep.mubr.msk.bf16.mxu0 %vm744_vm0, %v743_v0  ;;  %551 = vmatpush3.bf16.msra.mxu1 %v601_v8  ;;  %v505_v8 = vld [vmem:[%s877_s7] ss:$0 sm:$0xff]  ;;  %s745_s7 = smov [#allocation10]  }
  0x40   :  { %552 = vmatprep.subr.bf16.mxu1 %v743_v0  ;;  %567 = vmatpush3.bf16.msra.mxu0 %v607_v14  ;;  %s469_s24 = sshll.u32 %s745_s7, 4  ;;  %s470_s24 = int_to_ptr.vmem [resolvable:$true] %s469_s24 }
  0x41   :  { %568 = vmatprep.subr.bf16.mxu0 %v743_v0  ;;  %p712_p7 = scmp.lt.s32.totalorder %s470_s24, %s470_s24 }
  0x43   :  { %553 = vmatpush3.bf16.msra.mxu1 %v602_v9 }
  0x44   :  { %554 = vmatprep.subr.bf16.mxu1 %v743_v0  ;;  %569 = vmatpush3.bf16.msra.mxu0 %v608_v15 }
  0x45   :  { %570 = vmatprep.subr.bf16.mxu0 %v743_v0 }
  0x47   :  { %555 = vmatpush3.bf16.msra.mxu1 %v603_v10 }
  0x48   :  { %556 = vmatprep.subr.bf16.mxu1 %v743_v0  ;;  %571 = vmatpush3.bf16.msra.mxu0 %v609_v16 }
  0x49   :  { %572 = vmatprep.subr.bf16.mxu0 %v743_v0 }
  0x4b   :  { %557 = vmatpush3.bf16.msra.mxu1 %v604_v11 }
  0x4c   :  { %558 = vmatprep.subr.bf16.mxu1 %v743_v0  ;;  %573 = vmatpush3.bf16.msra.mxu0 %v610_v17 }
  0x4d   :  { %574 = vmatprep.subr.bf16.mxu0 %v743_v0 }
  0x4f   :  { %559 = vmatpush3.bf16.msra.mxu1 %v605_v12 }
  0x50   :  { %560 = vmatprep.subr.bf16.mxu1 %v743_v0  ;;  %575 = vmatpush3.bf16.msra.mxu0 %v611_v18  ;;  %v506_v18 = vld [vmem:[%s878_s8] ss:$0 sm:$0xff] }
  0x51   :  { %576 = vmatprep.subr.bf16.mxu0 %v743_v0 }
  0x53   :  { %561 = vmatpush3.bf16.msra.mxu1 %v606_v13  ;;  %v507_v13 = vld [vmem:[%s879_s9] ss:$0 sm:$0xff]  ;;  %s707_s9 = scalar_lea.vmem %s470_s24, 128 }
  0x54   :  { %577 = vmatpush3.bf16.msra.mxu0 %v612_v29  ;;  %p708_p6 = scmp.ne.s32.totalorder %s470_s24, %s707_s9  ;;  %p713_p8 = scmp.lt.s32.totalorder %s707_s9, %s707_s9 }
  0x55   :  { %578 = vmatprep.subr.bf16.mxu0 %v743_v0 }
  0x56   :  { %p714_p9 = por %p713_p8, %p712_p7 }
  0x58   :  { %579 = vmatpush3.bf16.msra.mxu0 %v613_v30  ;;  %p715_p10 = pnand %p714_p9, %p708_p6 }
  0x59   :  { %580 = vmatprep.subr.bf16.mxu0 %v743_v0 }
  0x5c   :  { %581 = vmatpush3.bf16.msra.mxu0 %v614_v31 }
  0xfe   :  { %v156_v20 = vpop.f32.mrf.mxu0 }
  0xff   :  { %v157_v22 = vadd.f32 %v483_v19, %v156_v20 }
 0x100   :  { %v544_v21 = vpop.f32.mrf.mxu0 }
 0x101   :  { %v163_v26 = vmax.f32 %v157_v22, 0.0 }
 0x102   :  { %v159_v23 = vpop.f32.mrf.mxu0 }
 0x103   :  { %v160_v24 = vadd.f32 %v483_v19, %v159_v23 }
 0x104   :  { %v545_v25 = vpop.f32.mrf.mxu0 }
 0x105   :  { %v164_v27 = vmax.f32 %v160_v24, 0.0 }
 0x107   :  { %v165_v28 = vpack.c.bf16 %v164_v27, %v163_v26 }
 0x109   :  { %563 = vmatmul.mubr.bf16.vlgmr.msra.gmra.mxu1 %v165_v28 }
 0x1c9   :  { %v271_v33 = vpop.f32.mrf.mxu1 }
 0x1ca   :  { %v272_v35 = vadd.f32 %v487_v32, %v271_v33 }
 0x1cb   :  { %v564_v34 = vpop.f32.mrf.mxu1 }
 0x1cc   :  { %v278_v39 = vmax.f32 %v272_v35, 0.0 }
 0x1cd   :  { %v274_v36 = vpop.f32.mrf.mxu1 }
 0x1ce   :  { %v275_v37 = vadd.f32 %v487_v32, %v274_v36 }
 0x1cf   :  { %v565_v38 = vpop.f32.mrf.mxu1 }
 0x1d0   :  { %v279_v40 = vmax.f32 %v275_v37, 0.0 }
 0x1d2   :  { %v280_v41 = vpack.c.bf16 %v279_v40, %v278_v39 }
 0x1d4   :  { %583 = vmatmul.mubr.bf16.vlgmr.msra.gmra.mxu0 %v280_v41 }
 0x294   :  { %v386_v43 = vpop.f32.mrf.mxu0 }
 0x295   :  { %v387_v44 = vadd.f32 %v496_v42, %v386_v43 }
 0x296   :  { %v584_v45 = vpop.f32.mrf.mxu0 }
 0x297   :  { %v397_v46 = vand.u32 2147483647, %v387_v44  ;;  %v395_v4 = vmax.f32 %v387_v44, 0.0 }
 0x298   :  { %v389_v47 = vpop.f32.mrf.mxu0 }
 0x299   :  { %v399_v48 = vsub.f32 0.0, %v397_v46  ;;  %v390_v49 = vadd.f32 %v496_v42, %v389_v47 }
 0x29a   :  { %v585_v50 = vpop.f32.mrf.mxu0 }
 0x29b   :  { %v401_v51 = vmul.f32 1.442695, %v399_v48  ;;  %v398_v52 = vand.u32 2147483647, %v390_v49  ;;  %v396_v14 = vmax.f32 %v390_v49, 0.0 }
 0x29d   :  { %615 = vpow2.f32 %v401_v51  ;;  %v400_v53 = vsub.f32 0.0, %v398_v52 }
 0x29f   :  { %v403_v54 = vmul.f32 1.442695, %v400_v53 }
 0x2a1   :  { %617 = vpow2.f32 %v403_v54 }
 0x2aa   :  { %v616_v55 = vpop.eup %615 }
 0x2ab   :  { %v405_v56 = vadd.f32 1.0, %v616_v55  ;;  %v408_v59 = vmul.f32 -0.5, %v616_v55  ;;  %v411_v62 = vand.u32 2147483647, %v616_v55 }
 0x2ad   :  { %619 = vlog2.f32 %v405_v56  ;;  %v409_v60 = vadd.f32 1.0, %v408_v59  ;;  %vm412_vm2 = vcmp.lt.f32.partialorder %v411_v62, 0.0004427343 }
 0x2ae   :  { %v618_v57 = vpop.eup %617  ;;  %621 = vtanh.f32 %v387_v44 }
 0x2af   :  { %v414_v58 = vadd.f32 1.0, %v618_v57  ;;  %623 = vtanh.f32 %v390_v49  ;;  %v417_v61 = vmul.f32 -0.5, %v618_v57  ;;  %v410_v1 = vmul.f32 %v616_v55, %v409_v60 }
 0x2b0   :  { %v420_v5 = vand.u32 2147483647, %v618_v57 }
 0x2b1   :  { %625 = vlog2.f32 %v414_v58  ;;  %v418_v2 = vadd.f32 1.0, %v417_v61 }
 0x2b2   :  { %vm421_vm3 = vcmp.lt.f32.partialorder %v420_v5, 0.0004427343 }
 0x2b3   :  { %v419_v12 = vmul.f32 %v618_v57, %v418_v2 }
 0x2ba   :  { %v620_v63 = vpop.eup %619 }
 0x2bb   :  { %v407_v0 = vmul.f32 0.6931472, %v620_v63  ;;  %v622_v3 = vpop.eup %621 }
 0x2bc   :  { %v624_v6 = vpop.eup %623  ;;  %v432_v15 = vmul.f32 %v622_v3, %v505_v8 }
 0x2bd   :  { %v413_v7 = vsel %vm412_vm2, %v410_v1, %v407_v0  ;;  %v433_v16 = vmul.f32 %v624_v6, %v505_v8 }
 0x2be   :  { %v626_v9 = vpop.eup %625  ;;  %v423_v10 = vadd.f32 %v413_v7, %v395_v4  ;;  %v441_v21 = vadd.f32 %v506_v18, %v432_v15 }
 0x2bf   :  { %v416_v11 = vmul.f32 0.6931472, %v626_v9  ;;  %v442_v22 = vadd.f32 %v506_v18, %v433_v16 }
 0x2c0   :  { %v450_v20 = vmul.f32 %v507_v13, %v423_v10 }
 0x2c1   :  { %v422_v17 = vsel %vm421_vm3, %v419_v12, %v416_v11 }
 0x2c2   :  { %v424_v19 = vadd.f32 %v422_v17, %v396_v14  ;;  %v452_v24 = vadd.f32 %v450_v20, %v441_v21 }
 0x2c4   :  { %v451_v23 = vmul.f32 %v507_v13, %v424_v19 }
 0x2c6   :  { %v453_v25 = vadd.f32 %v451_v23, %v442_v22 }
 0x2c8   :  { %v515_v26 = vpack.c.bf16 %v453_v25, %v452_v24 }
 0x2ca   :  { %516 = vst [vmem:[#allocation10] sm:$0xff] %v515_v26  }
 0x2cb   :  { %718 = shalt.err (!%p715_p10)
}
 0x2cc   :  { %475 = dma.vmem_to_hbm [thread:$0]  %s470_s24, 128, %s880_s10, [#allocation4], %s736_s16, %s736_s16, %s737_s17  }
 0x2cd   :  { %733 = dma.done.wait [#allocation4], 128  }
 0x2ce   :  { %734 = vsyncadd [#allocation4], 4294967168 }
 0x2cf   :  { %479 = vsyncpa [#allocation3], 1 }
 0x2d0   :  { %480 = vsyncpa [#allocation6], 1 }
 0x2d1   :  { %481 = vsyncpa [#allocation9], 1 }
 0x2d2   :  { %482 = vsyncpa [#allocation4], 1 }

</bundles_post_ra>
